<compile_context>
chip_gen: v6e
topology: v6e:2x2x1
jax: 0.10.0
libtpu: 0.0.40
codegen_flags: <defaults>
</compile_context>

<pallas_src>
import functools

import jax
import jax.numpy as jnp
from jax.experimental import pallas as pl
from jax.experimental.pallas import tpu as pltpu

LANE = 128  # TPU lane width; all layer widths are padded to this.


# ---------------------------------------------------------------------------
# Kernel
# ---------------------------------------------------------------------------
def dueling_dqn_kernel(x_ref, w1_ref, w2_ref, w3_ref, w4_ref, b_ref, q_ref):
    """Fused 4-matmul dueling-DQN forward for one batch tile.

    All weights are lane-padded to 128 columns, the bias block is (4, 128),
    and q_ref is (TB, 128), so every bias add and the final store are
    full-width (unmasked) vector ops. Dots run with bf16 (or f32) operands
    and f32 accumulation; bias/ReLU stay in f32.
    """
    cdt = w1_ref.dtype  # compute dtype of the matmul operands (bf16 or f32)

    x = x_ref[...]

    # fc1 + ReLU : (TB, state_dim) @ (state_dim, 128)
    h = jnp.dot(x.astype(cdt), w1_ref[...], preferred_element_type=jnp.float32)
    h = jnp.maximum(h + b_ref[0:1, :], 0.0)

    # fc2 + ReLU : (TB, 128) @ (128, 128)
    h = jnp.dot(h.astype(cdt), w2_ref[...], preferred_element_type=jnp.float32)
    h = jnp.maximum(h + b_ref[1:2, :], 0.0)

    # fused [value_fc | adv_fc] hidden layer + ReLU : (TB, 128) @ (128, 128)
    h = jnp.dot(h.astype(cdt), w3_ref[...], preferred_element_type=jnp.float32)
    h = jnp.maximum(h + b_ref[2:3, :], 0.0)

    # fused dueling head: Q = V + A - mean(A) folded into one matmul + bias.
    q = jnp.dot(h.astype(cdt), w4_ref[...], preferred_element_type=jnp.float32)
    q_ref[...] = q + b_ref[3:4, :]


# ---------------------------------------------------------------------------
# Parameter fusion + padding (hoisted out of the hot path; run once per
# parameter update, NOT per forward call)
# ---------------------------------------------------------------------------
def _pad_to(arr, rows, cols):
    r, c = arr.shape
    return jnp.pad(arr, ((0, rows - r), (0, cols - c)))


def _round_up(n, m):
    return ((n + m - 1) // m) * m


def prepare_params(params, compute_dtype=jnp.bfloat16):
    """Fold the two branches + dueling combine into 4 lane-padded weights.

    Returns (w1, w2, w3, w4, biases, action_dim). Call once per parameter
    update (do NOT jit this together with the per-step forward).
    """
    (w1, b1, w2, b2, wv1, bv1, wv2, bv2, wa1, ba1, wa2, ba2) = params
    action_dim = int(wa2.shape[1])

    # Layer 3: [value_fc | adv_fc] -> (32, 32)
    w3 = jnp.concatenate([wv1, wa1], axis=1)
    b3 = jnp.concatenate([bv1, ba1], axis=1)

    # Layer 4: Q[:, j] = v_hid @ wv2 + bv2 + a_hid @ (wa2[:,j] - mean_k wa2[:,k])
    #                    + (ba2[j] - mean(ba2))   (algebraically exact)
    wa2_mean = jnp.mean(wa2, axis=1, keepdims=True)          # (16, 1)
    ba2_mean = jnp.mean(ba2, axis=1, keepdims=True)          # (1, 1)
    top = jnp.broadcast_to(wv2, (wv2.shape[0], action_dim))  # value rows (16, A)
    bottom = wa2 - wa2_mean                                  # adv rows   (16, A)
    w4 = jnp.concatenate([top, bottom], axis=0)              # (32, A)
    b4 = bv2 + ba2 - ba2_mean                                # (1, A)

    # Lane-pad everything to 128 columns (and matching rows). Padded columns
    # stay exactly 0 through zero bias + ReLU, so results are unchanged; the
    # head output is sliced back to action_dim in the wrapper.
    w1p = _pad_to(w1, w1.shape[0], LANE).astype(compute_dtype)  # (state_dim, 128)
    w2p = _pad_to(w2, LANE, LANE).astype(compute_dtype)         # (128, 128)
    w3p = _pad_to(w3, LANE, LANE).astype(compute_dtype)         # (128, 128)
    w4p = _pad_to(w4, LANE, LANE).astype(compute_dtype)         # (128, 128)

    biases = jnp.concatenate(
        [_pad_to(b, 1, LANE) for b in (b1, b2, b3, b4)], axis=0
    ).astype(jnp.float32)                                       # (4, 128)

    return (w1p, w2p, w3p, w4p, biases, action_dim)


# ---------------------------------------------------------------------------
# Forward wrapper
# ---------------------------------------------------------------------------
@functools.partial(jax.jit, static_argnames=("block_batch",))
def _forward_impl(x, w1, w2, w3, w4, biases, *, block_batch):
    batch, state_dim = x.shape

    # Batch tile: big enough to amortize per-step overhead, capped so that
    # (a) large batches still give >= 2 grid steps ("parallel" axis -> both
    #     v7x TensorCores get work), and
    # (b) the VMEM footprint stays well under the v5e 16 MiB scoped default.
    tb = min(block_batch, batch)
    if batch > 512:
        tb = min(tb, _round_up(pl.cdiv(batch, 2), 8))
    grid = (pl.cdiv(batch, tb),)

    def resident(arr):  # whole-array block, DMA'd once, stays VMEM-resident
        return pl.BlockSpec(arr.shape, lambda i: (0, 0))

    q_pad = pl.pallas_call(
        dueling_dqn_kernel,
        out_shape=jax.ShapeDtypeStruct((batch, LANE), jnp.float32),
        grid=grid,
        in_specs=[
            pl.BlockSpec((tb, state_dim), lambda i: (i, 0)),  # x: batch-tiled
            resident(w1), resident(w2), resident(w3), resident(w4),
            resident(biases),
        ],
        out_specs=pl.BlockSpec((tb, LANE), lambda i: (i, 0)),  # lane-dense out
        compiler_params=pltpu.CompilerParams(
            dimension_semantics=("parallel",)),
    )(x, w1, w2, w3, w4, biases)

    return q_pad


def dueling_dqn_forward(x, fused_params, *, block_batch=2048):
    """x: (batch, state_dim) float32. fused_params: output of prepare_params."""
    w1, w2, w3, w4, biases, action_dim = fused_params
    q_pad = _forward_impl(x, w1, w2, w3, w4, biases, block_batch=block_batch)
    return q_pad[:, :action_dim]


# ---------------------------------------------------------------------------
# Init + reference (matches the PyTorch module, unfused)
# ---------------------------------------------------------------------------
def init_params(key, state_dim, action_dim):
    """nn.Linear-style init; weights already transposed to (in, out)."""
    dims = [
        (state_dim, 64),   # fc1
        (64, 32),          # fc2
        (32, 16),          # value_fc
        (16, 1),           # value_out
        (32, 16),          # adv_fc
        (16, action_dim),  # adv_out
    ]
    params = []
    for (fan_in, fan_out) in dims:
        key, kw, kb = jax.random.split(key, 3)
        bound = 1.0 / jnp.sqrt(float(fan_in))
        w = jax.random.uniform(kw, (fan_in, fan_out), jnp.float32, -bound, bound)
        b = jax.random.uniform(kb, (1, fan_out), jnp.float32, -bound, bound)
        params.extend([w, b])
    return tuple(params)


def reference_forward(x, params):
    """Plain-JAX reference of the original (unfused) forward pass."""
    (w1, b1, w2, b2, wv1, bv1, wv2, bv2, wa1, ba1, wa2, ba2) = params
    h = jnp.maximum(x @ w1 + b1, 0.0)
    h = jnp.maximum(h @ w2 + b2, 0.0)
    v = jnp.maximum(h @ wv1 + bv1, 0.0)
    v = v @ wv2 + bv2
    a = jnp.maximum(h @ wa1 + ba1, 0.0)
    a = a @ wa2 + ba2
    return v + a - jnp.mean(a, axis=1, keepdims=True)


# ---------------------------------------------------------------------------
if __name__ == "__main__":
    state_dim, action_dim = 16, 4

    key = jax.random.PRNGKey(0)
    key, kx = jax.random.split(key)
    params = init_params(key, state_dim, action_dim)

    # --- f32 compute path: fusion + padding must be exact vs the reference.
    fused_f32 = prepare_params(params, compute_dtype=jnp.float32)
    x_small = jax.random.normal(kx, (2, state_dim), jnp.float32)
    q_small = jax.block_until_ready(dueling_dqn_forward(x_small, fused_f32))
    q_small_ref = reference_forward(x_small, params)
    assert q_small.shape == (2, action_dim)
    assert jnp.allclose(q_small, q_small_ref, atol=1e-4, rtol=1e-4)

    # --- bf16 compute path (default, MXU-native on v6e/v7x) + multi-tile grid
    #     (exercises batch tiling, resident weights, lane-dense output).
    fused_bf16 = prepare_params(params)  # compute_dtype=jnp.bfloat16
    key, kx2 = jax.random.split(key)
    x_big = jax.random.normal(kx2, (64, state_dim), jnp.float32)
    q_big = jax.block_until_ready(
        dueling_dqn_forward(x_big, fused_bf16, block_batch=16))
    q_big_ref = reference_forward(x_big, params)
    assert q_big.shape == (64, action_dim)
    assert jnp.allclose(q_big, q_big_ref, atol=3e-2, rtol=3e-2)

    print("KERNEL_OK")
</pallas_src>

<mosaic_0001>
module attributes {stable_mosaic.version = 11 : i64} {
  func.func @dueling_dqn_kernel(%arg0: i32, %arg1: memref<2x16xf32, #tpu.memory_space<vmem>>, %arg2: memref<16x128xf32, #tpu.memory_space<vmem>>, %arg3: memref<128x128xf32, #tpu.memory_space<vmem>>, %arg4: memref<128x128xf32, #tpu.memory_space<vmem>>, %arg5: memref<128x128xf32, #tpu.memory_space<vmem>>, %arg6: memref<4x128xf32, #tpu.memory_space<vmem>>, %arg7: memref<2x128xf32, #tpu.memory_space<vmem>>) attributes {dimension_semantics = [#tpu.dimension_semantics<parallel>], iteration_bounds = array<i64: 1>, scalar_prefetch = 0 : i64, scratch_operands = 0 : i64, tpu.core_type = #tpu.core_type<tc>, window_params = [{transform_indices = @transform_0, window_bounds = array<i64: 2, 16>}, {pipeline_mode = #tpu.pipeline_mode<synchronous>, transform_indices = @transform_1, window_bounds = array<i64: 16, 128>}, {pipeline_mode = #tpu.pipeline_mode<synchronous>, transform_indices = @transform_2, window_bounds = array<i64: 128, 128>}, {pipeline_mode = #tpu.pipeline_mode<synchronous>, transform_indices = @transform_3, window_bounds = array<i64: 128, 128>}, {pipeline_mode = #tpu.pipeline_mode<synchronous>, transform_indices = @transform_4, window_bounds = array<i64: 128, 128>}, {pipeline_mode = #tpu.pipeline_mode<synchronous>, transform_indices = @transform_5, window_bounds = array<i64: 4, 128>}, {transform_indices = @transform_6, window_bounds = array<i64: 2, 128>}]} {
    %c0 = arith.constant 0 : index
    %c0_0 = arith.constant 0 : index
    %0 = vector.load %arg1[%c0, %c0_0] : memref<2x16xf32, #tpu.memory_space<vmem>>, vector<2x16xf32>
    %c0_1 = arith.constant 0 : index
    %c0_2 = arith.constant 0 : index
    %1 = vector.load %arg2[%c0_1, %c0_2] : memref<16x128xf32, #tpu.memory_space<vmem>>, vector<16x128xf32>
    %cst = arith.constant dense<0.000000e+00> : vector<2x128xf32>
    %2 = tpu.matmul %0, %1, %cst {dimension_numbers = #tpu.dot_dimension_numbers<[1], [0], [0], [1], [0, 0, 1, 1], [], []>} : vector<2x16xf32>, vector<16x128xf32>, vector<2x128xf32> -> vector<2x128xf32>
    %c0_3 = arith.constant 0 : index
    %c0_4 = arith.constant 0 : index
    %3 = vector.load %arg6[%c0_3, %c0_4] : memref<4x128xf32, #tpu.memory_space<vmem>>, vector<1x128xf32>
    %4 = vector.broadcast %3 : vector<1x128xf32> to vector<2x128xf32>
    %5 = arith.addf %2, %4 : vector<2x128xf32>
    %cst_5 = arith.constant 0.000000e+00 : f32
    %6 = vector.broadcast %cst_5 : f32 to vector<2x128xf32>
    %7 = arith.maximumf %5, %6 : vector<2x128xf32>
    %c0_6 = arith.constant 0 : index
    %c0_7 = arith.constant 0 : index
    %8 = vector.load %arg3[%c0_6, %c0_7] : memref<128x128xf32, #tpu.memory_space<vmem>>, vector<128x128xf32>
    %cst_8 = arith.constant dense<0.000000e+00> : vector<2x128xf32>
    %9 = tpu.matmul %7, %8, %cst_8 {dimension_numbers = #tpu.dot_dimension_numbers<[1], [0], [0], [1], [0, 0, 1, 1], [], []>} : vector<2x128xf32>, vector<128x128xf32>, vector<2x128xf32> -> vector<2x128xf32>
    %c1 = arith.constant 1 : index
    %c0_9 = arith.constant 0 : index
    %10 = vector.load %arg6[%c1, %c0_9] : memref<4x128xf32, #tpu.memory_space<vmem>>, vector<1x128xf32>
    %11 = vector.broadcast %10 : vector<1x128xf32> to vector<2x128xf32>
    %12 = arith.addf %9, %11 : vector<2x128xf32>
    %cst_10 = arith.constant 0.000000e+00 : f32
    %13 = vector.broadcast %cst_10 : f32 to vector<2x128xf32>
    %14 = arith.maximumf %12, %13 : vector<2x128xf32>
    %c0_11 = arith.constant 0 : index
    %c0_12 = arith.constant 0 : index
    %15 = vector.load %arg4[%c0_11, %c0_12] : memref<128x128xf32, #tpu.memory_space<vmem>>, vector<128x128xf32>
    %cst_13 = arith.constant dense<0.000000e+00> : vector<2x128xf32>
    %16 = tpu.matmul %14, %15, %cst_13 {dimension_numbers = #tpu.dot_dimension_numbers<[1], [0], [0], [1], [0, 0, 1, 1], [], []>} : vector<2x128xf32>, vector<128x128xf32>, vector<2x128xf32> -> vector<2x128xf32>
    %c2 = arith.constant 2 : index
    %c0_14 = arith.constant 0 : index
    %17 = vector.load %arg6[%c2, %c0_14] : memref<4x128xf32, #tpu.memory_space<vmem>>, vector<1x128xf32>
    %18 = vector.broadcast %17 : vector<1x128xf32> to vector<2x128xf32>
    %19 = arith.addf %16, %18 : vector<2x128xf32>
    %cst_15 = arith.constant 0.000000e+00 : f32
    %20 = vector.broadcast %cst_15 : f32 to vector<2x128xf32>
    %21 = arith.maximumf %19, %20 : vector<2x128xf32>
    %c0_16 = arith.constant 0 : index
    %c0_17 = arith.constant 0 : index
    %22 = vector.load %arg5[%c0_16, %c0_17] : memref<128x128xf32, #tpu.memory_space<vmem>>, vector<128x128xf32>
    %cst_18 = arith.constant dense<0.000000e+00> : vector<2x128xf32>
    %23 = tpu.matmul %21, %22, %cst_18 {dimension_numbers = #tpu.dot_dimension_numbers<[1], [0], [0], [1], [0, 0, 1, 1], [], []>} : vector<2x128xf32>, vector<128x128xf32>, vector<2x128xf32> -> vector<2x128xf32>
    %c3 = arith.constant 3 : index
    %c0_19 = arith.constant 0 : index
    %24 = vector.load %arg6[%c3, %c0_19] : memref<4x128xf32, #tpu.memory_space<vmem>>, vector<1x128xf32>
    %25 = vector.broadcast %24 : vector<1x128xf32> to vector<2x128xf32>
    %26 = arith.addf %23, %25 : vector<2x128xf32>
    %c0_20 = arith.constant 0 : index
    %c0_21 = arith.constant 0 : index
    %27 = vector.load %arg7[%c0_20, %c0_21] : memref<2x128xf32, #tpu.memory_space<vmem>>, vector<2x128xf32>
    tpu.vector_store %arg7[%c0_20, %c0_21], %26 {strides = array<i32>} : memref<2x128xf32, #tpu.memory_space<vmem>>, vector<2x128xf32>,
    return
  }
  func.func @transform_0(%arg0: i32) -> (i32, i32) {
    %c0_i32 = arith.constant 0 : i32
    %c0_i32_0 = arith.constant 0 : i32
    return %arg0, %c0_i32 : i32, i32
  }
  func.func @transform_1(%arg0: i32) -> (i32, i32) {
    %c0_i32 = arith.constant 0 : i32
    %c0_i32_0 = arith.constant 0 : i32
    %c0_i32_1 = arith.constant 0 : i32
    return %c0_i32, %c0_i32_0 : i32, i32
  }
  func.func @transform_2(%arg0: i32) -> (i32, i32) {
    %c0_i32 = arith.constant 0 : i32
    %c0_i32_0 = arith.constant 0 : i32
    %c0_i32_1 = arith.constant 0 : i32
    return %c0_i32, %c0_i32_0 : i32, i32
  }
  func.func @transform_3(%arg0: i32) -> (i32, i32) {
    %c0_i32 = arith.constant 0 : i32
    %c0_i32_0 = arith.constant 0 : i32
    %c0_i32_1 = arith.constant 0 : i32
    return %c0_i32, %c0_i32_0 : i32, i32
  }
  func.func @transform_4(%arg0: i32) -> (i32, i32) {
    %c0_i32 = arith.constant 0 : i32
    %c0_i32_0 = arith.constant 0 : i32
    %c0_i32_1 = arith.constant 0 : i32
    return %c0_i32, %c0_i32_0 : i32, i32
  }
  func.func @transform_5(%arg0: i32) -> (i32, i32) {
    %c0_i32 = arith.constant 0 : i32
    %c0_i32_0 = arith.constant 0 : i32
    %c0_i32_1 = arith.constant 0 : i32
    return %c0_i32, %c0_i32_0 : i32, i32
  }
  func.func @transform_6(%arg0: i32) -> (i32, i32) {
    %c0_i32 = arith.constant 0 : i32
    %c0_i32_0 = arith.constant 0 : i32
    return %arg0, %c0_i32 : i32, i32
  }
}

</mosaic_0001>

<bundles_post_ra>
// kernel: _forward_impl.1
= control target key start
LH: loop header
LB: loop body
LE: loop exit
PB: predicated region body
PF: predicated region fallthrough
CT: control target
= control target key end

     0   :  { %11 = vsyncpa [#allocation3], 0  ;;  %s920_s0 = inlined_call_operand.hbm [shape: f32[2,16], index: 0, kind: input, shape index: {}]   ;;  %s921_s1 = inlined_call_operand.hbm [shape: f32[16,128], index: 1, kind: input, shape index: {}]   ;;  %s922_s2 = inlined_call_operand.hbm [shape: f32[128,128], index: 2, kind: input, shape index: {}]   ;;  %s923_s3 = inlined_call_operand.hbm [shape: f32[128,128], index: 3, kind: input, shape index: {}]   ;;  %s924_s4 = inlined_call_operand.hbm [shape: f32[128,128], index: 4, kind: input, shape index: {}]   ;;  %s925_s5 = inlined_call_operand.vmem [shape: f32[4,128], index: 5, kind: input, shape index: {}]   ;;  %s926_s6 = inlined_call_operand.hbm [shape: f32[2,128], index: 6, kind: output, shape index: {}]  }
   0x1   :  { %12 = vsyncpa [#allocation6], 0 }
   0x2   :  { %13 = vsyncpa [#allocation9], 0 }
   0x3   :  { %14 = vsyncpa [#allocation4], 0  ;;  %s775_s21 = smov [#allocation5]  }
   0x4   :  { %s30_s22 = sshll.u32 %s775_s21, 4  ;;  %s31_s22 = int_to_ptr.vmem [resolvable:$true] %s30_s22 }
   0x5   :  { %s655_s23 = scalar_lea.vmem %s31_s22, 256  ;;  %p660_p1 = scmp.lt.s32.totalorder %s31_s22, %s31_s22 }
   0x6   :  { %p656_p0 = scmp.ne.s32.totalorder %s31_s22, %s655_s23  ;;  %p661_p2 = scmp.lt.s32.totalorder %s655_s23, %s655_s23 }
   0x8   :  { %p662_p3 = por %p661_p2, %p660_p1 }
   0xa   :  { %p663_p4 = pnand %p662_p3, %p656_p0 }
   0xc   :  { %666 = shalt.err (!%p663_p4)
}
   0xd   :  { %s776_s24 = smov 128   ;;  %s777_s25 = smov 8  }
   0xe   :  { %36 = dma.hbm_to_vmem [thread:$0]  %s921_s1, 256, %s31_s22, [#allocation6], %s776_s24, %s776_s24, %s777_s25  }
   0xf   :  { %s778_s28 = smov [#allocation8]   ;;  %s779_s30 = smov [#allocation2]  }
  0x10   :  { %s54_s29 = sshll.u32 %s778_s28, 4  ;;  %s21_s7 = sshll.u32 %s779_s30, 4  ;;  %s55_s29 = int_to_ptr.vmem [resolvable:$true] %s54_s29  ;;  %s22_s7 = int_to_ptr.vmem [resolvable:$true] %s21_s7 }
  0x11   :  { %s675_s8 = scalar_lea.vmem %s55_s29, 2048  ;;  %p680_p6 = scmp.lt.s32.totalorder %s55_s29, %s55_s29 }
  0x12   :  { %p676_p5 = scmp.ne.s32.totalorder %s55_s29, %s675_s8  ;;  %p681_p7 = scmp.lt.s32.totalorder %s675_s8, %s675_s8 }
  0x14   :  { %p682_p8 = por %p681_p7, %p680_p6 }
  0x16   :  { %p683_p9 = pnand %p682_p8, %p676_p5 }
  0x18   :  { %686 = shalt.err (!%p683_p9)
}
  0x19   :  { %60 = dma.hbm_to_vmem [thread:$0]  %s923_s3, 2048, %s55_s29, [#allocation9], %s776_s24, %s776_s24, %s777_s25  }
  0x1a   :  { %s695_s1 = scalar_lea.vmem %s22_s7, 32  ;;  %p700_p11 = scmp.lt.s32.totalorder %s22_s7, %s22_s7 }
  0x1b   :  { %p696_p10 = scmp.ne.s32.totalorder %s22_s7, %s695_s1  ;;  %p701_p12 = scmp.lt.s32.totalorder %s695_s1, %s695_s1 }
  0x1d   :  { %p702_p13 = por %p701_p12, %p700_p11 }
  0x1f   :  { %p703_p0 = pnand %p702_p13, %p696_p10 }
  0x21   :  { %706 = shalt.err (!%p703_p0)
}
  0x22   :  { %24 = dma.hbm_to_vmem [thread:$0]  %s920_s0, 32, %s22_s7, [#allocation3]  }
  0x23   :  { %s780_s13 = smov [#allocation7]   ;;  %s781_s15 = smov [#allocation10]  }
  0x24   :  { %s42_s14 = sshll.u32 %s780_s13, 4  ;;  %s66_s16 = sshll.u32 %s781_s15, 4  ;;  %s43_s14 = int_to_ptr.vmem [resolvable:$true] %s42_s14  ;;  %s67_s16 = int_to_ptr.vmem [resolvable:$true] %s66_s16 }
  0x25   :  { %s715_s17 = scalar_lea.vmem %s43_s14, 2048  ;;  %p720_p2 = scmp.lt.s32.totalorder %s43_s14, %s43_s14 }
  0x26   :  { %p716_p1 = scmp.ne.s32.totalorder %s43_s14, %s715_s17  ;;  %p721_p3 = scmp.lt.s32.totalorder %s715_s17, %s715_s17 }
  0x28   :  { %p722_p4 = por %p721_p3, %p720_p2 }
  0x2a   :  { %p723_p5 = pnand %p722_p4, %p716_p1 }
  0x2c   :  { %726 = shalt.err (!%p723_p5)
}
  0x2d   :  { %48 = dma.hbm_to_vmem [thread:$0]  %s922_s2, 2048, %s43_s14, [#allocation6], %s776_s24, %s776_s24, %s777_s25  }
  0x2e   :  { %s735_s0 = scalar_lea.vmem %s67_s16, 2048  ;;  %p740_p7 = scmp.lt.s32.totalorder %s67_s16, %s67_s16 }
  0x2f   :  { %p736_p6 = scmp.ne.s32.totalorder %s67_s16, %s735_s0  ;;  %p741_p8 = scmp.lt.s32.totalorder %s735_s0, %s735_s0 }
  0x31   :  { %p742_p9 = por %p741_p8, %p740_p7 }
  0x33   :  { %p743_p10 = pnand %p742_p9, %p736_p6 }
  0x35   :  { %746 = shalt.err (!%p743_p10)
}
  0x36   :  { %72 = dma.hbm_to_vmem [thread:$0]  %s924_s4, 2048, %s67_s16, [#allocation9], %s776_s24, %s776_s24, %s777_s25  }
  0x37   :  { %767 = dma.done.wait [#allocation3], 32  }
  0x38   :  { %768 = vsyncadd [#allocation3], 4294967264 }
  0x39   :  { %769 = dma.done.wait [#allocation6], 2304  }
  0x3a   :  { %770 = vsyncadd [#allocation6], 4294964992 }
  0x3b   :  { %771 = dma.done.wait [#allocation9], 4096  }
  0x3c   :  { %772 = vsyncadd [#allocation9], 4294963200  ;;  %v782_v0 = vmov 0.0   ;;  %vm783_vm0 = vmmov 0   ;;  %v92_v1 = vld [vmem:[#allocation5 + $0x8] sm:$0xff]  ;;  %v91_v2 = vld [vmem:[#allocation5] sm:$0xff] }
  0x3d   :  { %525 = vmatprep.subr.mxu0 %v782_v0  ;;  %529 = vmatprep.mubr.msk.f32.mxu0 %vm783_vm0, %v782_v0  ;;  %v90_v3 = vld [vmem:[#allocation2] sm:$0x3]  ;;  %vm98_vm1 = vcmask 130048   ;;  %v188_v4 = vld [vmem:[#allocation7 + $0x78] sm:$0xff]  ;;  %v187_v5 = vld [vmem:[#allocation7 + $0x70] sm:$0xff]  ;;  %s784_s27 = smov [#allocation11]  }
  0x3e   :  { %532 = vmatprep.subr.mxu1 %v782_v0  ;;  %564 = vmatprep.mubr.msk.f32.mxu1 %vm783_vm0, %v782_v0  ;;  %v186_v6 = vld [vmem:[#allocation7 + $0x68] sm:$0xff]  ;;  %v185_v7 = vld [vmem:[#allocation7 + $0x60] sm:$0xff]  ;;  %v184_v8 = vld [vmem:[#allocation7 + $0x58] sm:$0xff]  ;;  %s455_s28 = sshll.u32 %s784_s27, 4  ;;  %s456_s28 = int_to_ptr.vmem [resolvable:$true] %s455_s28 }
  0x3f   :  { %526 = vmatpush3.msra.mxu0 %v92_v1  ;;  %533 = vmatpush3.msra.mxu1 %v188_v4  ;;  %v183_v9 = vld [vmem:[#allocation7 + $0x50] sm:$0xff]  ;;  %v182_v10 = vld [vmem:[#allocation7 + $0x48] sm:$0xff]  ;;  %v181_v11 = vld [vmem:[#allocation7 + $0x40] sm:$0xff]  ;;  %s747_s29 = scalar_lea.vmem %s456_s28, 32  ;;  %p752_p12 = scmp.lt.s32.totalorder %s456_s28, %s456_s28 }
  0x40   :  { %527 = vmatprep.subr.mxu0 %v782_v0  ;;  %534 = vmatprep.subr.mxu1 %v782_v0  ;;  %v180_v12 = vld [vmem:[#allocation7 + $0x38] sm:$0xff]  ;;  %v179_v13 = vld [vmem:[#allocation7 + $0x30] sm:$0xff]  ;;  %v178_v14 = vld [vmem:[#allocation7 + $0x28] sm:$0xff]  ;;  %p748_p11 = scmp.ne.s32.totalorder %s456_s28, %s747_s29  ;;  %p753_p13 = scmp.lt.s32.totalorder %s747_s29, %s747_s29 }
  0x41   :  { %528 = vmatpush3.msra.mxu0 %v91_v2  ;;  %535 = vmatpush3.msra.mxu1 %v187_v5  ;;  %v177_v15 = vld [vmem:[#allocation7 + $0x20] sm:$0xff]  ;;  %v176_v16 = vld [vmem:[#allocation7 + $0x18] sm:$0xff]  ;;  %v175_v17 = vld [vmem:[#allocation7 + $0x10] sm:$0xff] }
  0x42   :  { %530 = vmatmul.mubr.msk.f32.vlgmr.msra.gmra.mxu0 %vm98_vm1, %v90_v3  ;;  %536 = vmatprep.subr.mxu1 %v782_v0  ;;  %v174_v18 = vld [vmem:[#allocation7 + $0x8] sm:$0xff]  ;;  %v173_v19 = vld [vmem:[#allocation7] sm:$0xff]  ;;  %v280_v20 = vld [vmem:[#allocation8 + $0x78] sm:$0xff]  ;;  %p754_p0 = por %p753_p13, %p752_p12 }
  0x43   :  { %567 = vmatprep.subr.mxu0 %v782_v0  ;;  %537 = vmatpush3.msra.mxu1 %v186_v6  ;;  %v279_v21 = vld [vmem:[#allocation8 + $0x70] sm:$0xff]  ;;  %v278_v22 = vld [vmem:[#allocation8 + $0x68] sm:$0xff]  ;;  %v277_v23 = vld [vmem:[#allocation8 + $0x60] sm:$0xff] }
  0x44   :  { %599 = vmatprep.mubr.msk.f32.mxu0 %vm783_vm0, %v782_v0  ;;  %538 = vmatprep.subr.mxu1 %v782_v0  ;;  %v276_v24 = vld [vmem:[#allocation8 + $0x58] sm:$0xff]  ;;  %v275_v25 = vld [vmem:[#allocation8 + $0x50] sm:$0xff]  ;;  %v274_v26 = vld [vmem:[#allocation8 + $0x48] sm:$0xff]  ;;  %p755_p1 = pnand %p754_p0, %p748_p11 }
  0x45   :  { %539 = vmatpush3.msra.mxu1 %v185_v7  ;;  %568 = vmatpush3.msra.mxu0 %v280_v20  ;;  %v273_v27 = vld [vmem:[#allocation8 + $0x40] sm:$0xff]  ;;  %v272_v28 = vld [vmem:[#allocation8 + $0x38] sm:$0xff]  ;;  %v271_v29 = vld [vmem:[#allocation8 + $0x30] sm:$0xff] }
  0x46   :  { %540 = vmatprep.subr.mxu1 %v782_v0  ;;  %569 = vmatprep.subr.mxu0 %v782_v0  ;;  %v270_v30 = vld [vmem:[#allocation8 + $0x28] sm:$0xff]  ;;  %v269_v31 = vld [vmem:[#allocation8 + $0x20] sm:$0xff]  ;;  %v268_v32 = vld [vmem:[#allocation8 + $0x18] sm:$0xff] }
  0x47   :  { %541 = vmatpush3.msra.mxu1 %v184_v8  ;;  %570 = vmatpush3.msra.mxu0 %v279_v21  ;;  %v466_v33 = vld [vmem:[%s925_s5] ss:$0 sm:$0xff]  ;;  %v267_v38 = vld [vmem:[#allocation8 + $0x10] sm:$0xff]  ;;  %v265_v40 = vld [vmem:[#allocation8] sm:$0xff] }
  0x48   :  { %542 = vmatprep.subr.mxu1 %v782_v0  ;;  %571 = vmatprep.subr.mxu0 %v782_v0  ;;  %v266_v39 = vld [vmem:[#allocation8 + $0x8] sm:$0xff]  ;;  %v372_v41 = vld [vmem:[#allocation10 + $0x78] sm:$0xff]  ;;  %v371_v42 = vld [vmem:[#allocation10 + $0x70] sm:$0xff] }
  0x49   :  { %543 = vmatpush3.msra.mxu1 %v183_v9  ;;  %572 = vmatpush3.msra.mxu0 %v278_v22  ;;  %v370_v43 = vld [vmem:[#allocation10 + $0x68] sm:$0xff]  ;;  %v369_v44 = vld [vmem:[#allocation10 + $0x60] sm:$0xff]  ;;  %v368_v45 = vld [vmem:[#allocation10 + $0x58] sm:$0xff] }
  0x4a   :  { %544 = vmatprep.subr.mxu1 %v782_v0  ;;  %573 = vmatprep.subr.mxu0 %v782_v0  ;;  %v367_v46 = vld [vmem:[#allocation10 + $0x50] sm:$0xff]  ;;  %v366_v47 = vld [vmem:[#allocation10 + $0x48] sm:$0xff]  ;;  %v365_v48 = vld [vmem:[#allocation10 + $0x40] sm:$0xff] }
  0x4b   :  { %545 = vmatpush3.msra.mxu1 %v182_v10  ;;  %574 = vmatpush3.msra.mxu0 %v277_v23  ;;  %v364_v49 = vld [vmem:[#allocation10 + $0x38] sm:$0xff]  ;;  %v363_v50 = vld [vmem:[#allocation10 + $0x30] sm:$0xff]  ;;  %v362_v51 = vld [vmem:[#allocation10 + $0x28] sm:$0xff] }
  0x4c   :  { %546 = vmatprep.subr.mxu1 %v782_v0  ;;  %575 = vmatprep.subr.mxu0 %v782_v0  ;;  %v361_v52 = vld [vmem:[#allocation10 + $0x20] sm:$0xff]  ;;  %v360_v53 = vld [vmem:[#allocation10 + $0x18] sm:$0xff]  ;;  %v468_v54 = vld [vmem:[%s925_s5 + $0x1] ss:$0 sm:$0xff] }
  0x4d   :  { %547 = vmatpush3.msra.mxu1 %v181_v11  ;;  %576 = vmatpush3.msra.mxu0 %v276_v24  ;;  %v359_v59 = vld [vmem:[#allocation10 + $0x10] sm:$0xff]  ;;  %v358_v60 = vld [vmem:[#allocation10 + $0x8] sm:$0xff]  ;;  %v357_v61 = vld [vmem:[#allocation10] sm:$0xff] }
  0x4e   :  { %548 = vmatprep.subr.mxu1 %v782_v0  ;;  %577 = vmatprep.subr.mxu0 %v782_v0  ;;  %v469_v62 = vld [vmem:[%s925_s5 + $0x2] ss:$0 sm:$0xff]  ;;  %v470_v4 = vld [vmem:[%s925_s5 + $0x3] ss:$0 sm:$0xff] }
  0x4f   :  { %549 = vmatpush3.msra.mxu1 %v180_v12  ;;  %578 = vmatpush3.msra.mxu0 %v275_v25 }
  0x50   :  { %550 = vmatprep.subr.mxu1 %v782_v0  ;;  %579 = vmatprep.subr.mxu0 %v782_v0 }
  0x51   :  { %551 = vmatpush3.msra.mxu1 %v179_v13  ;;  %580 = vmatpush3.msra.mxu0 %v274_v26 }
  0x52   :  { %552 = vmatprep.subr.mxu1 %v782_v0  ;;  %581 = vmatprep.subr.mxu0 %v782_v0 }
  0x53   :  { %553 = vmatpush3.msra.mxu1 %v178_v14  ;;  %582 = vmatpush3.msra.mxu0 %v273_v27 }
  0x54   :  { %554 = vmatprep.subr.mxu1 %v782_v0  ;;  %583 = vmatprep.subr.mxu0 %v782_v0 }
  0x55   :  { %555 = vmatpush3.msra.mxu1 %v177_v15  ;;  %584 = vmatpush3.msra.mxu0 %v272_v28 }
  0x56   :  { %556 = vmatprep.subr.mxu1 %v782_v0  ;;  %585 = vmatprep.subr.mxu0 %v782_v0 }
  0x57   :  { %557 = vmatpush3.msra.mxu1 %v176_v16  ;;  %586 = vmatpush3.msra.mxu0 %v271_v29 }
  0x58   :  { %558 = vmatprep.subr.mxu1 %v782_v0  ;;  %587 = vmatprep.subr.mxu0 %v782_v0 }
  0x59   :  { %559 = vmatpush3.msra.mxu1 %v175_v17  ;;  %588 = vmatpush3.msra.mxu0 %v270_v30 }
  0x5a   :  { %560 = vmatprep.subr.mxu1 %v782_v0  ;;  %589 = vmatprep.subr.mxu0 %v782_v0 }
  0x5b   :  { %561 = vmatpush3.msra.mxu1 %v174_v18  ;;  %590 = vmatpush3.msra.mxu0 %v269_v31 }
  0x5c   :  { %562 = vmatprep.subr.mxu1 %v782_v0  ;;  %591 = vmatprep.subr.mxu0 %v782_v0 }
  0x5d   :  { %563 = vmatpush3.msra.mxu1 %v173_v19  ;;  %592 = vmatpush3.msra.mxu0 %v268_v32 }
  0x5e   :  { %602 = vmatprep.subr.mxu1 %v782_v0  ;;  %593 = vmatprep.subr.mxu0 %v782_v0 }
  0x5f   :  { %594 = vmatpush3.msra.mxu0 %v267_v38 }
  0x60   :  { %595 = vmatprep.subr.mxu0 %v782_v0 }
  0x61   :  { %596 = vmatpush3.msra.mxu0 %v266_v39 }
  0x62   :  { %597 = vmatprep.subr.mxu0 %v782_v0 }
  0x63   :  { %598 = vmatpush3.msra.mxu0 %v265_v40 }
 0x102   :  { %v168_v34 = vpop.f32.mrf.mxu0 }
 0x103   :  { %v169_v35 = vadd.f32 %v466_v33, %v168_v34 }
 0x104   :  { %v531_v36 = vpop.f32.mrf.mxu0 }
 0x105   :  { %v172_v37 = vmax.f32 %v169_v35, 0.0 }
 0x107   :  { %565 = vmatmul.mubr.f32.vlgmr.msra.gmra.mxu1 %v172_v37 }
 0x108   :  { %634 = vmatprep.mubr.msk.f32.mxu1 %vm783_vm0, %v782_v0  ;;  %603 = vmatpush3.msra.mxu1 %v372_v41 }
 0x109   :  { %604 = vmatprep.subr.mxu1 %v782_v0 }
 0x10a   :  { %605 = vmatpush3.msra.mxu1 %v371_v42 }
 0x10b   :  { %606 = vmatprep.subr.mxu1 %v782_v0 }
 0x10c   :  { %607 = vmatpush3.msra.mxu1 %v370_v43 }
 0x10d   :  { %608 = vmatprep.subr.mxu1 %v782_v0 }
 0x10e   :  { %609 = vmatpush3.msra.mxu1 %v369_v44 }
 0x10f   :  { %610 = vmatprep.subr.mxu1 %v782_v0 }
 0x110   :  { %611 = vmatpush3.msra.mxu1 %v368_v45 }
 0x111   :  { %612 = vmatprep.subr.mxu1 %v782_v0 }
 0x112   :  { %613 = vmatpush3.msra.mxu1 %v367_v46 }
 0x113   :  { %614 = vmatprep.subr.mxu1 %v782_v0 }
 0x114   :  { %615 = vmatpush3.msra.mxu1 %v366_v47 }
 0x115   :  { %616 = vmatprep.subr.mxu1 %v782_v0 }
 0x116   :  { %617 = vmatpush3.msra.mxu1 %v365_v48 }
 0x117   :  { %618 = vmatprep.subr.mxu1 %v782_v0 }
 0x118   :  { %619 = vmatpush3.msra.mxu1 %v364_v49 }
 0x119   :  { %620 = vmatprep.subr.mxu1 %v782_v0 }
 0x11a   :  { %621 = vmatpush3.msra.mxu1 %v363_v50 }
 0x11b   :  { %622 = vmatprep.subr.mxu1 %v782_v0 }
 0x11c   :  { %623 = vmatpush3.msra.mxu1 %v362_v51 }
 0x11d   :  { %624 = vmatprep.subr.mxu1 %v782_v0 }
 0x11e   :  { %625 = vmatpush3.msra.mxu1 %v361_v52 }
 0x11f   :  { %626 = vmatprep.subr.mxu1 %v782_v0 }
 0x120   :  { %627 = vmatpush3.msra.mxu1 %v360_v53 }
 0x121   :  { %628 = vmatprep.subr.mxu1 %v782_v0 }
 0x122   :  { %629 = vmatpush3.msra.mxu1 %v359_v59 }
 0x123   :  { %630 = vmatprep.subr.mxu1 %v782_v0 }
 0x124   :  { %631 = vmatpush3.msra.mxu1 %v358_v60 }
 0x125   :  { %632 = vmatprep.subr.mxu1 %v782_v0 }
 0x126   :  { %633 = vmatpush3.msra.mxu1 %v357_v61 }
 0x1c7   :  { %v260_v55 = vpop.f32.mrf.mxu1 }
 0x1c8   :  { %v261_v56 = vadd.f32 %v468_v54, %v260_v55 }
 0x1c9   :  { %v566_v57 = vpop.f32.mrf.mxu1 }
 0x1ca   :  { %v264_v58 = vmax.f32 %v261_v56, 0.0 }
 0x1cc   :  { %600 = vmatmul.mubr.f32.vlgmr.msra.gmra.mxu0 %v264_v58 }
 0x28c   :  { %v352_v63 = vpop.f32.mrf.mxu0 }
 0x28d   :  { %v353_v1 = vadd.f32 %v469_v62, %v352_v63 }
 0x28e   :  { %v601_v2 = vpop.f32.mrf.mxu0 }
 0x28f   :  { %v356_v3 = vmax.f32 %v353_v1, 0.0 }
 0x291   :  { %635 = vmatmul.mubr.f32.vlgmr.msra.gmra.mxu1 %v356_v3 }
 0x351   :  { %v444_v5 = vpop.f32.mrf.mxu1 }
 0x352   :  { %v445_v6 = vadd.f32 %v470_v4, %v444_v5 }
 0x353   :  { %v636_v0 = vpop.f32.mrf.mxu1 }
 0x354   :  { %448 = vst [vmem:[#allocation11] sm:$0x3] %v445_v6 }
 0x355   :  { %758 = shalt.err (!%p755_p1)
}
 0x356   :  { %458 = dma.vmem_to_hbm [thread:$0]  %s456_s28, 32, %s926_s6, [#allocation4]  }
 0x357   :  { %773 = dma.done.wait [#allocation4], 32  }
 0x358   :  { %774 = vsyncadd [#allocation4], 4294967264 }
 0x359   :  { %462 = vsyncpa [#allocation3], 1 }
 0x35a   :  { %463 = vsyncpa [#allocation6], 1 }
 0x35b   :  { %464 = vsyncpa [#allocation9], 1 }
 0x35c   :  { %465 = vsyncpa [#allocation4], 1 }

</bundles_post_ra>
